<compile_context>
chip_gen: v7x
topology: tpu7x:2x2x1
jax: 0.10.0
libtpu: 0.0.40
codegen_flags: <defaults>
</compile_context>

<pallas_src>
import functools

import jax
import jax.numpy as jnp
from jax.experimental import pallas as pl
from jax.experimental.pallas import tpu as pltpu

LN_EPS = 1e-5
PAD = 128            # lane width every feature dim is padded to
H1, H2 = 90, 48      # hidden sizes from the PyTorch module

# w_blob slice indices
W_E1, W_E2, W_MULV, W_D1, W_D2, W_OUT = range(6)
# v_blob row indices
(B_E1, G_E1, BE_E1,
 B_E2, G_E2, BE_E2,
 B_MULV,
 B_D1, G_D1, BE_D1,
 B_D2, G_D2, BE_D2,
 B_OUT) = range(14)
N_VROWS = 16         # padded to a sublane multiple


def _round_up(n, m):
    return ((n + m - 1) // m) * m


def _pad2d(a, rows, cols):
    r, c = a.shape
    return jnp.pad(a.astype(jnp.float32), ((0, rows - r), (0, cols - c)))


# --------------------------------------------------------------------------
# Kernel
# --------------------------------------------------------------------------
def vae_kernel(x_ref, eps_ref, w_ref, v_ref, out_ref, pad_ref, *,
               in_features, latent_size, compact_out):
    """Fused VAE forward on one (bt, ...) batch tile. All math is 128-lane."""

    def row(i):                     # (1, PAD) parameter row, broadcasts
        return v_ref[i:i + 1, :]

    def linear(h, wi, bi):
        return jnp.dot(h, w_ref[wi],
                       preferred_element_type=jnp.float32) + row(bi)

    def layernorm(h, n_real, gi, bi):
        # h has exact zeros in lanes >= n_real (zero weight cols / bias),
        # so the 128-lane sums only need an analytic correction for the
        # (PAD - n_real) * mean^2 term the padded lanes add after centering.
        n = jnp.float32(n_real)
        mean = jnp.sum(h, axis=-1, keepdims=True) / n
        c = h - mean
        var = (jnp.sum(c * c, axis=-1, keepdims=True)
               - jnp.float32(PAD - n_real) * mean * mean) / n
        inv = jax.lax.rsqrt(var + LN_EPS)
        # padded gamma/beta are zero -> padded lanes stay exactly zero
        return c * inv * row(gi) + row(bi)

    def load_lane_padded(src_ref, width):
        # Zero-pad a (bt, width) HBM block to (bt, PAD) inside VMEM.
        pad_ref[...] = jnp.zeros_like(pad_ref)
        pad_ref[:, :width] = src_ref[...]
        return pad_ref[...]

    # ---------------- encoder ----------------
    x = load_lane_padded(x_ref, in_features)
    h = jnp.maximum(layernorm(linear(x, W_E1, B_E1), H1, G_E1, BE_E1), 0.0)
    h = jnp.maximum(layernorm(linear(h, W_E2, B_E2), H2, G_E2, BE_E2), 0.0)

    # fused mu | log_var projection: lanes [0,L)=mu, [L,2L)=log_var, rest 0
    mulv = linear(h, W_MULV, B_MULV)

    # ---------------- reparameterization (no masks needed) ----------------
    eps = load_lane_padded(eps_ref, latent_size)          # zeros beyond L
    log_var = pltpu.roll(mulv, PAD - latent_size, axis=1)  # log_var -> [0,L)
    z = mulv + eps * jnp.exp(0.5 * log_var)
    # lanes [0,L): mu + eps*std (real). Lanes >= L hold finite garbage that
    # only ever multiplies the zero rows (>= L) of w_d1.

    # ---------------- decoder ----------------
    d = jnp.maximum(layernorm(linear(z, W_D1, B_D1), H2, G_D1, BE_D1), 0.0)
    d = jnp.maximum(layernorm(linear(d, W_D2, B_D2), H1, G_D2, BE_D2), 0.0)
    logits = linear(d, W_OUT, B_OUT)    # real values in lanes [0, in_features)

    # softmax over the real feature lanes only
    lane = jax.lax.broadcasted_iota(jnp.int32, (1, PAD), 1)
    in_mask = lane < in_features
    m = jnp.max(jnp.where(in_mask, logits, -jnp.inf), axis=-1, keepdims=True)
    e = jnp.where(in_mask, jnp.exp(logits - m), 0.0)
    s = jnp.sum(e, axis=-1, keepdims=True)
    r = pl.reciprocal(s, approx=True)   # EUP slot (otherwise idle)
    r = r * (2.0 - s * r)               # one Newton step -> ~f32 accuracy
    probs = e * r

    if compact_out:
        # single lane-dense slab: [probs | mu | log_var | 0]
        mulv_sh = pltpu.roll(mulv, in_features, axis=1)
        out_ref[...] = jnp.where(in_mask, probs, mulv_sh)
    else:
        # fallback: [probs | mulv] (still lane-dense, 128-aligned stores)
        out_ref[:, 0:PAD] = probs
        out_ref[:, PAD:2 * PAD] = mulv


# --------------------------------------------------------------------------
# Parameter init / packing
# --------------------------------------------------------------------------
def init_vae_params(key, in_features, latent_size, dtype=jnp.float32):
    """PyTorch-style init: W, b ~ U(-1/sqrt(fan_in), 1/sqrt(fan_in))."""
    dims = [
        ("e1", in_features, 90, True),
        ("e2", 90, 48, True),
        ("mu", 48, latent_size, False),
        ("lv", 48, latent_size, False),
        ("d1", latent_size, 48, True),
        ("d2", 48, 90, True),
        ("out", 90, in_features, False),
    ]
    params = {}
    for name, fan_in, fan_out, has_ln in dims:
        key, kw, kb = jax.random.split(key, 3)
        bound = 1.0 / jnp.sqrt(jnp.asarray(fan_in, dtype))
        params[f"w_{name}"] = jax.random.uniform(
            kw, (fan_in, fan_out), dtype, -bound, bound)
        params[f"b_{name}"] = jax.random.uniform(
            kb, (1, fan_out), dtype, -bound, bound)
        if has_ln:
            params[f"g_{name}"] = jnp.ones((1, fan_out), dtype)
            params[f"be_{name}"] = jnp.zeros((1, fan_out), dtype)
    return params


def pack_params(params):
    """Pack the unpadded params into two lane-padded blobs for the kernel."""
    w_mulv = jnp.concatenate([params["w_mu"], params["w_lv"]], axis=1)
    w_blob = jnp.stack([
        _pad2d(params["w_e1"], PAD, PAD),
        _pad2d(params["w_e2"], PAD, PAD),
        _pad2d(w_mulv, PAD, PAD),
        _pad2d(params["w_d1"], PAD, PAD),
        _pad2d(params["w_d2"], PAD, PAD),
        _pad2d(params["w_out"], PAD, PAD),
    ])
    b_mulv = jnp.concatenate([params["b_mu"], params["b_lv"]], axis=1)
    rows = [
        params["b_e1"], params["g_e1"], params["be_e1"],
        params["b_e2"], params["g_e2"], params["be_e2"],
        b_mulv,
        params["b_d1"], params["g_d1"], params["be_d1"],
        params["b_d2"], params["g_d2"], params["be_d2"],
        params["b_out"],
    ]
    v_rows = [_pad2d(r, 1, PAD) for r in rows]
    v_rows += [jnp.zeros((1, PAD), jnp.float32)] * (N_VROWS - len(v_rows))
    v_blob = jnp.concatenate(v_rows, axis=0)
    return w_blob, v_blob


# --------------------------------------------------------------------------
# Wrapper
# --------------------------------------------------------------------------
@functools.partial(jax.jit,
                   static_argnames=("in_features", "latent_size", "block_b"))
def vae_forward(x, eps, w_blob, v_blob, *, in_features, latent_size,
                block_b=1024):
    if in_features > PAD or 2 * latent_size > PAD:
        raise ValueError("feature dims must fit in one 128-lane tile")
    B = x.shape[0]

    # Batch tile: as large as block_b allows, but <= ceil(B/2) so batches of
    # >= 16 rows always give >= 2 grid steps (uses both v7x TensorCores).
    half = _round_up(max((B + 1) // 2, 1), 8)
    bt = max(8, min(block_b, half))
    B_pad = _round_up(B, bt)

    # Batch-pad only (no lane padding in HBM); zero rows are harmless.
    x_p = jnp.pad(x.astype(jnp.float32), ((0, B_pad - B), (0, 0)))
    eps_p = jnp.pad(eps.astype(jnp.float32), ((0, B_pad - B), (0, 0)))

    compact = in_features + 2 * latent_size <= PAD
    out_lanes = PAD if compact else 2 * PAD

    kernel = functools.partial(vae_kernel, in_features=in_features,
                               latent_size=latent_size, compact_out=compact)

    cost = pl.CostEstimate(
        flops=2 * 6 * B_pad * PAD * PAD,
        transcendentals=2 * B_pad * PAD,
        bytes_accessed=4 * (B_pad * (in_features + latent_size + out_lanes)
                            + 6 * PAD * PAD + N_VROWS * PAD),
    )

    out = pl.pallas_call(
        kernel,
        out_shape=jax.ShapeDtypeStruct((B_pad, out_lanes), jnp.float32),
        grid=(B_pad // bt,),
        in_specs=[
            # full-extent last dims (== array dims) -> legal, no HBM lane pad
            pl.BlockSpec((bt, in_features), lambda i: (i, 0)),
            pl.BlockSpec((bt, latent_size), lambda i: (i, 0)),
            # parameter blobs: same block every step -> resident across grid
            pl.BlockSpec((6, PAD, PAD), lambda i: (0, 0, 0)),
            pl.BlockSpec((N_VROWS, PAD), lambda i: (0, 0)),
        ],
        out_specs=pl.BlockSpec((bt, out_lanes), lambda i: (i, 0)),
        scratch_shapes=[pltpu.VMEM((bt, PAD), jnp.float32)],
        compiler_params=pltpu.CompilerParams(
            dimension_semantics=("parallel",),
            vmem_limit_bytes=48 * 1024 * 1024),
        cost_estimate=cost,
    )(x_p, eps_p, w_blob, v_blob)

    x_reconst = out[:B, :in_features]
    if compact:
        mu = out[:B, in_features:in_features + latent_size]
        log_var = out[:B,
                      in_features + latent_size:in_features + 2 * latent_size]
    else:
        mu = out[:B, PAD:PAD + latent_size]
        log_var = out[:B, PAD + latent_size:PAD + 2 * latent_size]
    return x_reconst, mu, log_var


# --------------------------------------------------------------------------
# Pure-JAX reference (matches the PyTorch module)
# --------------------------------------------------------------------------
def vae_reference(x, eps, params):
    def ln(h, g, b):
        mean = jnp.mean(h, axis=-1, keepdims=True)
        var = jnp.mean((h - mean) ** 2, axis=-1, keepdims=True)
        return (h - mean) * jax.lax.rsqrt(var + LN_EPS) * g + b

    h = jax.nn.relu(ln(x @ params["w_e1"] + params["b_e1"],
                       params["g_e1"], params["be_e1"]))
    h = jax.nn.relu(ln(h @ params["w_e2"] + params["b_e2"],
                       params["g_e2"], params["be_e2"]))
    mu = h @ params["w_mu"] + params["b_mu"]
    log_var = h @ params["w_lv"] + params["b_lv"]
    z = mu + eps * jnp.exp(0.5 * log_var)
    d = jax.nn.relu(ln(z @ params["w_d1"] + params["b_d1"],
                       params["g_d1"], params["be_d1"]))
    d = jax.nn.relu(ln(d @ params["w_d2"] + params["b_d2"],
                       params["g_d2"], params["be_d2"]))
    logits = d @ params["w_out"] + params["b_out"]
    return jax.nn.softmax(logits, axis=-1), mu, log_var


if __name__ == "__main__":
    B = 8
    IN_FEATURES = 32
    LATENT = 16

    key = jax.random.PRNGKey(0)
    k_params, k_x, k_eps = jax.random.split(key, 3)

    params = init_vae_params(k_params, IN_FEATURES, LATENT)
    w_blob, v_blob = pack_params(params)

    x = jax.random.normal(k_x, (B, IN_FEATURES), jnp.float32)
    eps = jax.random.normal(k_eps, (B, LATENT), jnp.float32)

    x_reconst, mu, log_var = vae_forward(
        x, eps, w_blob, v_blob, in_features=IN_FEATURES, latent_size=LATENT)
    jax.block_until_ready((x_reconst, mu, log_var))

    # shape / normalization sanity checks
    assert x_reconst.shape == (B, IN_FEATURES)
    assert mu.shape == (B, LATENT) and log_var.shape == (B, LATENT)
    assert bool(jnp.allclose(jnp.sum(x_reconst, axis=1), 1.0, atol=1e-5))

    # numerical check against a pure-JAX reference of the PyTorch module
    xr_ref, mu_ref, lv_ref = vae_reference(x, eps, params)
    assert bool(jnp.allclose(x_reconst, xr_ref, atol=1e-4, rtol=1e-4))
    assert bool(jnp.allclose(mu, mu_ref, atol=1e-4, rtol=1e-4))
    assert bool(jnp.allclose(log_var, lv_ref, atol=1e-4, rtol=1e-4))

    print("KERNEL_OK")
</pallas_src>

<mosaic_0001>
module attributes {stable_mosaic.version = 11 : i64} {
  func.func @vae_kernel(%arg0: i32, %arg1: memref<8x32xf32, #tpu.memory_space<vmem>>, %arg2: memref<8x16xf32, #tpu.memory_space<vmem>>, %arg3: memref<6x128x128xf32, #tpu.memory_space<vmem>>, %arg4: memref<16x128xf32, #tpu.memory_space<vmem>>, %arg5: memref<8x128xf32, #tpu.memory_space<vmem>>, %arg6: memref<8x128xf32, #tpu.memory_space<vmem>>) attributes {dimension_semantics = [#tpu.dimension_semantics<parallel>], iteration_bounds = array<i64: 1>, scalar_prefetch = 0 : i64, scratch_operands = 1 : i64, tpu.core_type = #tpu.core_type<tc>, window_params = [{transform_indices = @transform_0, window_bounds = array<i64: 8, 32>}, {transform_indices = @transform_1, window_bounds = array<i64: 8, 16>}, {pipeline_mode = #tpu.pipeline_mode<synchronous>, transform_indices = @transform_2, window_bounds = array<i64: 6, 128, 128>}, {pipeline_mode = #tpu.pipeline_mode<synchronous>, transform_indices = @transform_3, window_bounds = array<i64: 16, 128>}, {transform_indices = @transform_4, window_bounds = array<i64: 8, 128>}]} {
    %cst = arith.constant 0.000000e+00 : f32
    %0 = vector.broadcast %cst : f32 to vector<8x128xf32>
    %c0 = arith.constant 0 : index
    %c0_0 = arith.constant 0 : index
    %1 = vector.load %arg6[%c0, %c0_0] : memref<8x128xf32, #tpu.memory_space<vmem>>, vector<8x128xf32>
    tpu.vector_store %arg6[%c0, %c0_0], %0 {strides = array<i32>} : memref<8x128xf32, #tpu.memory_space<vmem>>, vector<8x128xf32>,
    %c0_1 = arith.constant 0 : index
    %c0_2 = arith.constant 0 : index
    %2 = vector.load %arg1[%c0_1, %c0_2] : memref<8x32xf32, #tpu.memory_space<vmem>>, vector<8x32xf32>
    %c0_3 = arith.constant 0 : index
    %c0_4 = arith.constant 0 : index
    %3 = vector.load %arg6[%c0_3, %c0_4] : memref<8x128xf32, #tpu.memory_space<vmem>>, vector<8x32xf32>
    tpu.vector_store %arg6[%c0_3, %c0_4], %2 {strides = array<i32>} : memref<8x128xf32, #tpu.memory_space<vmem>>, vector<8x32xf32>,
    %c0_5 = arith.constant 0 : index
    %c0_6 = arith.constant 0 : index
    %4 = vector.load %arg6[%c0_5, %c0_6] : memref<8x128xf32, #tpu.memory_space<vmem>>, vector<8x128xf32>
    %c0_7 = arith.constant 0 : index
    %c0_8 = arith.constant 0 : index
    %c0_9 = arith.constant 0 : index
    %5 = vector.load %arg3[%c0_7, %c0_8, %c0_9] : memref<6x128x128xf32, #tpu.memory_space<vmem>>, vector<1x128x128xf32>
    %6 = vector.shape_cast %5 : vector<1x128x128xf32> to vector<128x128xf32>
    %cst_10 = arith.constant dense<0.000000e+00> : vector<8x128xf32>
    %7 = tpu.matmul %4, %6, %cst_10 {dimension_numbers = #tpu.dot_dimension_numbers<[1], [0], [0], [1], [0, 0, 1, 1], [], []>} : vector<8x128xf32>, vector<128x128xf32>, vector<8x128xf32> -> vector<8x128xf32>
    %c0_11 = arith.constant 0 : index
    %c0_12 = arith.constant 0 : index
    %8 = vector.load %arg4[%c0_11, %c0_12] : memref<16x128xf32, #tpu.memory_space<vmem>>, vector<1x128xf32>
    %9 = vector.broadcast %8 : vector<1x128xf32> to vector<8x128xf32>
    %10 = arith.addf %7, %9 : vector<8x128xf32>
    %cst_13 = arith.constant dense<0.000000e+00> : vector<8xf32>
    %11 = vector.multi_reduction <add>, %10, %cst_13 [1] : vector<8x128xf32> to vector<8xf32>
    %12 = vector.shape_cast %11 : vector<8xf32> to vector<8x1xf32>
    %cst_14 = arith.constant 9.000000e+01 : f32
    %13 = vector.broadcast %cst_14 : f32 to vector<8x1xf32>
    %14 = arith.divf %12, %13 : vector<8x1xf32>
    %15 = vector.broadcast %14 : vector<8x1xf32> to vector<8x128xf32>
    %16 = arith.subf %10, %15 : vector<8x128xf32>
    %17 = arith.mulf %16, %16 : vector<8x128xf32>
    %cst_15 = arith.constant dense<0.000000e+00> : vector<8xf32>
    %18 = vector.multi_reduction <add>, %17, %cst_15 [1] : vector<8x128xf32> to vector<8xf32>
    %19 = vector.shape_cast %18 : vector<8xf32> to vector<8x1xf32>
    %cst_16 = arith.constant 3.800000e+01 : f32
    %20 = vector.broadcast %cst_16 : f32 to vector<8x1xf32>
    %21 = arith.mulf %20, %14 : vector<8x1xf32>
    %22 = arith.mulf %21, %14 : vector<8x1xf32>
    %23 = arith.subf %19, %22 : vector<8x1xf32>
    %cst_17 = arith.constant 9.000000e+01 : f32
    %24 = vector.broadcast %cst_17 : f32 to vector<8x1xf32>
    %25 = arith.divf %23, %24 : vector<8x1xf32>
    %cst_18 = arith.constant 9.99999974E-6 : f32
    %26 = vector.broadcast %cst_18 : f32 to vector<8x1xf32>
    %27 = arith.addf %25, %26 : vector<8x1xf32>
    %28 = math.rsqrt %27 : vector<8x1xf32>
    %29 = vector.broadcast %28 : vector<8x1xf32> to vector<8x128xf32>
    %30 = arith.mulf %16, %29 : vector<8x128xf32>
    %c1 = arith.constant 1 : index
    %c0_19 = arith.constant 0 : index
    %31 = vector.load %arg4[%c1, %c0_19] : memref<16x128xf32, #tpu.memory_space<vmem>>, vector<1x128xf32>
    %32 = vector.broadcast %31 : vector<1x128xf32> to vector<8x128xf32>
    %33 = arith.mulf %30, %32 : vector<8x128xf32>
    %c2 = arith.constant 2 : index
    %c0_20 = arith.constant 0 : index
    %34 = vector.load %arg4[%c2, %c0_20] : memref<16x128xf32, #tpu.memory_space<vmem>>, vector<1x128xf32>
    %35 = vector.broadcast %34 : vector<1x128xf32> to vector<8x128xf32>
    %36 = arith.addf %33, %35 : vector<8x128xf32>
    %cst_21 = arith.constant 0.000000e+00 : f32
    %37 = vector.broadcast %cst_21 : f32 to vector<8x128xf32>
    %38 = arith.maximumf %36, %37 : vector<8x128xf32>
    %c1_22 = arith.constant 1 : index
    %c0_23 = arith.constant 0 : index
    %c0_24 = arith.constant 0 : index
    %39 = vector.load %arg3[%c1_22, %c0_23, %c0_24] : memref<6x128x128xf32, #tpu.memory_space<vmem>>, vector<1x128x128xf32>
    %40 = vector.shape_cast %39 : vector<1x128x128xf32> to vector<128x128xf32>
    %cst_25 = arith.constant dense<0.000000e+00> : vector<8x128xf32>
    %41 = tpu.matmul %38, %40, %cst_25 {dimension_numbers = #tpu.dot_dimension_numbers<[1], [0], [0], [1], [0, 0, 1, 1], [], []>} : vector<8x128xf32>, vector<128x128xf32>, vector<8x128xf32> -> vector<8x128xf32>
    %c3 = arith.constant 3 : index
    %c0_26 = arith.constant 0 : index
    %42 = vector.load %arg4[%c3, %c0_26] : memref<16x128xf32, #tpu.memory_space<vmem>>, vector<1x128xf32>
    %43 = vector.broadcast %42 : vector<1x128xf32> to vector<8x128xf32>
    %44 = arith.addf %41, %43 : vector<8x128xf32>
    %cst_27 = arith.constant dense<0.000000e+00> : vector<8xf32>
    %45 = vector.multi_reduction <add>, %44, %cst_27 [1] : vector<8x128xf32> to vector<8xf32>
    %46 = vector.shape_cast %45 : vector<8xf32> to vector<8x1xf32>
    %cst_28 = arith.constant 4.800000e+01 : f32
    %47 = vector.broadcast %cst_28 : f32 to vector<8x1xf32>
    %48 = arith.divf %46, %47 : vector<8x1xf32>
    %49 = vector.broadcast %48 : vector<8x1xf32> to vector<8x128xf32>
    %50 = arith.subf %44, %49 : vector<8x128xf32>
    %51 = arith.mulf %50, %50 : vector<8x128xf32>
    %cst_29 = arith.constant dense<0.000000e+00> : vector<8xf32>
    %52 = vector.multi_reduction <add>, %51, %cst_29 [1] : vector<8x128xf32> to vector<8xf32>
    %53 = vector.shape_cast %52 : vector<8xf32> to vector<8x1xf32>
    %cst_30 = arith.constant 8.000000e+01 : f32
    %54 = vector.broadcast %cst_30 : f32 to vector<8x1xf32>
    %55 = arith.mulf %54, %48 : vector<8x1xf32>
    %56 = arith.mulf %55, %48 : vector<8x1xf32>
    %57 = arith.subf %53, %56 : vector<8x1xf32>
    %cst_31 = arith.constant 4.800000e+01 : f32
    %58 = vector.broadcast %cst_31 : f32 to vector<8x1xf32>
    %59 = arith.divf %57, %58 : vector<8x1xf32>
    %cst_32 = arith.constant 9.99999974E-6 : f32
    %60 = vector.broadcast %cst_32 : f32 to vector<8x1xf32>
    %61 = arith.addf %59, %60 : vector<8x1xf32>
    %62 = math.rsqrt %61 : vector<8x1xf32>
    %63 = vector.broadcast %62 : vector<8x1xf32> to vector<8x128xf32>
    %64 = arith.mulf %50, %63 : vector<8x128xf32>
    %c4 = arith.constant 4 : index
    %c0_33 = arith.constant 0 : index
    %65 = vector.load %arg4[%c4, %c0_33] : memref<16x128xf32, #tpu.memory_space<vmem>>, vector<1x128xf32>
    %66 = vector.broadcast %65 : vector<1x128xf32> to vector<8x128xf32>
    %67 = arith.mulf %64, %66 : vector<8x128xf32>
    %c5 = arith.constant 5 : index
    %c0_34 = arith.constant 0 : index
    %68 = vector.load %arg4[%c5, %c0_34] : memref<16x128xf32, #tpu.memory_space<vmem>>, vector<1x128xf32>
    %69 = vector.broadcast %68 : vector<1x128xf32> to vector<8x128xf32>
    %70 = arith.addf %67, %69 : vector<8x128xf32>
    %cst_35 = arith.constant 0.000000e+00 : f32
    %71 = vector.broadcast %cst_35 : f32 to vector<8x128xf32>
    %72 = arith.maximumf %70, %71 : vector<8x128xf32>
    %c2_36 = arith.constant 2 : index
    %c0_37 = arith.constant 0 : index
    %c0_38 = arith.constant 0 : index
    %73 = vector.load %arg3[%c2_36, %c0_37, %c0_38] : memref<6x128x128xf32, #tpu.memory_space<vmem>>, vector<1x128x128xf32>
    %74 = vector.shape_cast %73 : vector<1x128x128xf32> to vector<128x128xf32>
    %cst_39 = arith.constant dense<0.000000e+00> : vector<8x128xf32>
    %75 = tpu.matmul %72, %74, %cst_39 {dimension_numbers = #tpu.dot_dimension_numbers<[1], [0], [0], [1], [0, 0, 1, 1], [], []>} : vector<8x128xf32>, vector<128x128xf32>, vector<8x128xf32> -> vector<8x128xf32>
    %c6 = arith.constant 6 : index
    %c0_40 = arith.constant 0 : index
    %76 = vector.load %arg4[%c6, %c0_40] : memref<16x128xf32, #tpu.memory_space<vmem>>, vector<1x128xf32>
    %77 = vector.broadcast %76 : vector<1x128xf32> to vector<8x128xf32>
    %78 = arith.addf %75, %77 : vector<8x128xf32>
    %cst_41 = arith.constant 0.000000e+00 : f32
    %79 = vector.broadcast %cst_41 : f32 to vector<8x128xf32>
    %c0_42 = arith.constant 0 : index
    %c0_43 = arith.constant 0 : index
    %80 = vector.load %arg6[%c0_42, %c0_43] : memref<8x128xf32, #tpu.memory_space<vmem>>, vector<8x128xf32>
    tpu.vector_store %arg6[%c0_42, %c0_43], %79 {strides = array<i32>} : memref<8x128xf32, #tpu.memory_space<vmem>>, vector<8x128xf32>,
    %c0_44 = arith.constant 0 : index
    %c0_45 = arith.constant 0 : index
    %81 = vector.load %arg2[%c0_44, %c0_45] : memref<8x16xf32, #tpu.memory_space<vmem>>, vector<8x16xf32>
    %c0_46 = arith.constant 0 : index
    %c0_47 = arith.constant 0 : index
    %82 = vector.load %arg6[%c0_46, %c0_47] : memref<8x128xf32, #tpu.memory_space<vmem>>, vector<8x16xf32>
    tpu.vector_store %arg6[%c0_46, %c0_47], %81 {strides = array<i32>} : memref<8x128xf32, #tpu.memory_space<vmem>>, vector<8x16xf32>,
    %c0_48 = arith.constant 0 : index
    %c0_49 = arith.constant 0 : index
    %83 = vector.load %arg6[%c0_48, %c0_49] : memref<8x128xf32, #tpu.memory_space<vmem>>, vector<8x128xf32>
    %c112_i32 = arith.constant 112 : i32
    %84 = tpu.dynamic_rotate %78 by %c112_i32 dim 1 : vector<8x128xf32>, i32 -> vector<8x128xf32>
    %cst_50 = arith.constant 5.000000e-01 : f32
    %85 = vector.broadcast %cst_50 : f32 to vector<8x128xf32>
    %86 = arith.mulf %85, %84 : vector<8x128xf32>
    %87 = math.exp %86 : vector<8x128xf32>
    %88 = arith.mulf %83, %87 : vector<8x128xf32>
    %89 = arith.addf %78, %88 : vector<8x128xf32>
    %c3_51 = arith.constant 3 : index
    %c0_52 = arith.constant 0 : index
    %c0_53 = arith.constant 0 : index
    %90 = vector.load %arg3[%c3_51, %c0_52, %c0_53] : memref<6x128x128xf32, #tpu.memory_space<vmem>>, vector<1x128x128xf32>
    %91 = vector.shape_cast %90 : vector<1x128x128xf32> to vector<128x128xf32>
    %cst_54 = arith.constant dense<0.000000e+00> : vector<8x128xf32>
    %92 = tpu.matmul %89, %91, %cst_54 {dimension_numbers = #tpu.dot_dimension_numbers<[1], [0], [0], [1], [0, 0, 1, 1], [], []>} : vector<8x128xf32>, vector<128x128xf32>, vector<8x128xf32> -> vector<8x128xf32>
    %c7 = arith.constant 7 : index
    %c0_55 = arith.constant 0 : index
    %93 = vector.load %arg4[%c7, %c0_55] : memref<16x128xf32, #tpu.memory_space<vmem>>, vector<1x128xf32>
    %94 = vector.broadcast %93 : vector<1x128xf32> to vector<8x128xf32>
    %95 = arith.addf %92, %94 : vector<8x128xf32>
    %cst_56 = arith.constant dense<0.000000e+00> : vector<8xf32>
    %96 = vector.multi_reduction <add>, %95, %cst_56 [1] : vector<8x128xf32> to vector<8xf32>
    %97 = vector.shape_cast %96 : vector<8xf32> to vector<8x1xf32>
    %cst_57 = arith.constant 4.800000e+01 : f32
    %98 = vector.broadcast %cst_57 : f32 to vector<8x1xf32>
    %99 = arith.divf %97, %98 : vector<8x1xf32>
    %100 = vector.broadcast %99 : vector<8x1xf32> to vector<8x128xf32>
    %101 = arith.subf %95, %100 : vector<8x128xf32>
    %102 = arith.mulf %101, %101 : vector<8x128xf32>
    %cst_58 = arith.constant dense<0.000000e+00> : vector<8xf32>
    %103 = vector.multi_reduction <add>, %102, %cst_58 [1] : vector<8x128xf32> to vector<8xf32>
    %104 = vector.shape_cast %103 : vector<8xf32> to vector<8x1xf32>
    %cst_59 = arith.constant 8.000000e+01 : f32
    %105 = vector.broadcast %cst_59 : f32 to vector<8x1xf32>
    %106 = arith.mulf %105, %99 : vector<8x1xf32>
    %107 = arith.mulf %106, %99 : vector<8x1xf32>
    %108 = arith.subf %104, %107 : vector<8x1xf32>
    %cst_60 = arith.constant 4.800000e+01 : f32
    %109 = vector.broadcast %cst_60 : f32 to vector<8x1xf32>
    %110 = arith.divf %108, %109 : vector<8x1xf32>
    %cst_61 = arith.constant 9.99999974E-6 : f32
    %111 = vector.broadcast %cst_61 : f32 to vector<8x1xf32>
    %112 = arith.addf %110, %111 : vector<8x1xf32>
    %113 = math.rsqrt %112 : vector<8x1xf32>
    %114 = vector.broadcast %113 : vector<8x1xf32> to vector<8x128xf32>
    %115 = arith.mulf %101, %114 : vector<8x128xf32>
    %c8 = arith.constant 8 : index
    %c0_62 = arith.constant 0 : index
    %116 = vector.load %arg4[%c8, %c0_62] : memref<16x128xf32, #tpu.memory_space<vmem>>, vector<1x128xf32>
    %117 = vector.broadcast %116 : vector<1x128xf32> to vector<8x128xf32>
    %118 = arith.mulf %115, %117 : vector<8x128xf32>
    %c9 = arith.constant 9 : index
    %c0_63 = arith.constant 0 : index
    %119 = vector.load %arg4[%c9, %c0_63] : memref<16x128xf32, #tpu.memory_space<vmem>>, vector<1x128xf32>
    %120 = vector.broadcast %119 : vector<1x128xf32> to vector<8x128xf32>
    %121 = arith.addf %118, %120 : vector<8x128xf32>
    %cst_64 = arith.constant 0.000000e+00 : f32
    %122 = vector.broadcast %cst_64 : f32 to vector<8x128xf32>
    %123 = arith.maximumf %121, %122 : vector<8x128xf32>
    %c4_65 = arith.constant 4 : index
    %c0_66 = arith.constant 0 : index
    %c0_67 = arith.constant 0 : index
    %124 = vector.load %arg3[%c4_65, %c0_66, %c0_67] : memref<6x128x128xf32, #tpu.memory_space<vmem>>, vector<1x128x128xf32>
    %125 = vector.shape_cast %124 : vector<1x128x128xf32> to vector<128x128xf32>
    %cst_68 = arith.constant dense<0.000000e+00> : vector<8x128xf32>
    %126 = tpu.matmul %123, %125, %cst_68 {dimension_numbers = #tpu.dot_dimension_numbers<[1], [0], [0], [1], [0, 0, 1, 1], [], []>} : vector<8x128xf32>, vector<128x128xf32>, vector<8x128xf32> -> vector<8x128xf32>
    %c10 = arith.constant 10 : index
    %c0_69 = arith.constant 0 : index
    %127 = vector.load %arg4[%c10, %c0_69] : memref<16x128xf32, #tpu.memory_space<vmem>>, vector<1x128xf32>
    %128 = vector.broadcast %127 : vector<1x128xf32> to vector<8x128xf32>
    %129 = arith.addf %126, %128 : vector<8x128xf32>
    %cst_70 = arith.constant dense<0.000000e+00> : vector<8xf32>
    %130 = vector.multi_reduction <add>, %129, %cst_70 [1] : vector<8x128xf32> to vector<8xf32>
    %131 = vector.shape_cast %130 : vector<8xf32> to vector<8x1xf32>
    %cst_71 = arith.constant 9.000000e+01 : f32
    %132 = vector.broadcast %cst_71 : f32 to vector<8x1xf32>
    %133 = arith.divf %131, %132 : vector<8x1xf32>
    %134 = vector.broadcast %133 : vector<8x1xf32> to vector<8x128xf32>
    %135 = arith.subf %129, %134 : vector<8x128xf32>
    %136 = arith.mulf %135, %135 : vector<8x128xf32>
    %cst_72 = arith.constant dense<0.000000e+00> : vector<8xf32>
    %137 = vector.multi_reduction <add>, %136, %cst_72 [1] : vector<8x128xf32> to vector<8xf32>
    %138 = vector.shape_cast %137 : vector<8xf32> to vector<8x1xf32>
    %cst_73 = arith.constant 3.800000e+01 : f32
    %139 = vector.broadcast %cst_73 : f32 to vector<8x1xf32>
    %140 = arith.mulf %139, %133 : vector<8x1xf32>
    %141 = arith.mulf %140, %133 : vector<8x1xf32>
    %142 = arith.subf %138, %141 : vector<8x1xf32>
    %cst_74 = arith.constant 9.000000e+01 : f32
    %143 = vector.broadcast %cst_74 : f32 to vector<8x1xf32>
    %144 = arith.divf %142, %143 : vector<8x1xf32>
    %cst_75 = arith.constant 9.99999974E-6 : f32
    %145 = vector.broadcast %cst_75 : f32 to vector<8x1xf32>
    %146 = arith.addf %144, %145 : vector<8x1xf32>
    %147 = math.rsqrt %146 : vector<8x1xf32>
    %148 = vector.broadcast %147 : vector<8x1xf32> to vector<8x128xf32>
    %149 = arith.mulf %135, %148 : vector<8x128xf32>
    %c11 = arith.constant 11 : index
    %c0_76 = arith.constant 0 : index
    %150 = vector.load %arg4[%c11, %c0_76] : memref<16x128xf32, #tpu.memory_space<vmem>>, vector<1x128xf32>
    %151 = vector.broadcast %150 : vector<1x128xf32> to vector<8x128xf32>
    %152 = arith.mulf %149, %151 : vector<8x128xf32>
    %c12 = arith.constant 12 : index
    %c0_77 = arith.constant 0 : index
    %153 = vector.load %arg4[%c12, %c0_77] : memref<16x128xf32, #tpu.memory_space<vmem>>, vector<1x128xf32>
    %154 = vector.broadcast %153 : vector<1x128xf32> to vector<8x128xf32>
    %155 = arith.addf %152, %154 : vector<8x128xf32>
    %cst_78 = arith.constant 0.000000e+00 : f32
    %156 = vector.broadcast %cst_78 : f32 to vector<8x128xf32>
    %157 = arith.maximumf %155, %156 : vector<8x128xf32>
    %c5_79 = arith.constant 5 : index
    %c0_80 = arith.constant 0 : index
    %c0_81 = arith.constant 0 : index
    %158 = vector.load %arg3[%c5_79, %c0_80, %c0_81] : memref<6x128x128xf32, #tpu.memory_space<vmem>>, vector<1x128x128xf32>
    %159 = vector.shape_cast %158 : vector<1x128x128xf32> to vector<128x128xf32>
    %cst_82 = arith.constant dense<0.000000e+00> : vector<8x128xf32>
    %160 = tpu.matmul %157, %159, %cst_82 {dimension_numbers = #tpu.dot_dimension_numbers<[1], [0], [0], [1], [0, 0, 1, 1], [], []>} : vector<8x128xf32>, vector<128x128xf32>, vector<8x128xf32> -> vector<8x128xf32>
    %c13 = arith.constant 13 : index
    %c0_83 = arith.constant 0 : index
    %161 = vector.load %arg4[%c13, %c0_83] : memref<16x128xf32, #tpu.memory_space<vmem>>, vector<1x128xf32>
    %162 = vector.broadcast %161 : vector<1x128xf32> to vector<8x128xf32>
    %163 = arith.addf %160, %162 : vector<8x128xf32>
    %164 = tpu.iota {dimensions = array<i32: 1>} : vector<1x128xi32>
    %c32_i32 = arith.constant 32 : i32
    %165 = vector.broadcast %c32_i32 : i32 to vector<1x128xi32>
    %166 = arith.cmpi slt, %164, %165 : vector<1x128xi32>
    %cst_84 = arith.constant 0xFF800000 : f32
    %167 = vector.shape_cast %166 : vector<1x128xi1> to vector<1x128xi1>
    %168 = vector.broadcast %167 : vector<1x128xi1> to vector<8x128xi1>
    %169 = vector.broadcast %cst_84 : f32 to vector<8x128xf32>
    %170 = arith.select %168, %163, %169 : vector<8x128xi1>, vector<8x128xf32>
    %cst_85 = arith.constant dense<0xFF800000> : vector<8xf32>
    %171 = vector.multi_reduction <maximumf>, %170, %cst_85 [1] : vector<8x128xf32> to vector<8xf32>
    %172 = vector.shape_cast %171 : vector<8xf32> to vector<8x1xf32>
    %173 = vector.broadcast %172 : vector<8x1xf32> to vector<8x128xf32>
    %174 = arith.subf %163, %173 : vector<8x128xf32>
    %175 = math.exp %174 : vector<8x128xf32>
    %cst_86 = arith.constant 0.000000e+00 : f32
    %176 = vector.shape_cast %166 : vector<1x128xi1> to vector<1x128xi1>
    %177 = vector.broadcast %176 : vector<1x128xi1> to vector<8x128xi1>
    %178 = vector.broadcast %cst_86 : f32 to vector<8x128xf32>
    %179 = arith.select %177, %175, %178 : vector<8x128xi1>, vector<8x128xf32>
    %cst_87 = arith.constant dense<0.000000e+00> : vector<8xf32>
    %180 = vector.multi_reduction <add>, %179, %cst_87 [1] : vector<8x128xf32> to vector<8xf32>
    %181 = vector.shape_cast %180 : vector<8xf32> to vector<8x1xf32>
    %182 = tpu.reciprocal %181 {approx = true} : vector<8x1xf32> -> vector<8x1xf32>
    %183 = arith.mulf %181, %182 : vector<8x1xf32>
    %cst_88 = arith.constant 2.000000e+00 : f32
    %184 = vector.broadcast %cst_88 : f32 to vector<8x1xf32>
    %185 = arith.subf %184, %183 : vector<8x1xf32>
    %186 = arith.mulf %182, %185 : vector<8x1xf32>
    %187 = vector.broadcast %186 : vector<8x1xf32> to vector<8x128xf32>
    %188 = arith.mulf %179, %187 : vector<8x128xf32>
    %c32_i32_89 = arith.constant 32 : i32
    %189 = tpu.dynamic_rotate %78 by %c32_i32_89 dim 1 : vector<8x128xf32>, i32 -> vector<8x128xf32>
    %190 = vector.shape_cast %166 : vector<1x128xi1> to vector<1x128xi1>
    %191 = vector.broadcast %190 : vector<1x128xi1> to vector<8x128xi1>
    %192 = arith.select %191, %188, %189 : vector<8x128xi1>, vector<8x128xf32>
    %c0_90 = arith.constant 0 : index
    %c0_91 = arith.constant 0 : index
    %193 = vector.load %arg5[%c0_90, %c0_91] : memref<8x128xf32, #tpu.memory_space<vmem>>, vector<8x128xf32>
    tpu.vector_store %arg5[%c0_90, %c0_91], %192 {strides = array<i32>} : memref<8x128xf32, #tpu.memory_space<vmem>>, vector<8x128xf32>,
    return
  }
  func.func @transform_0(%arg0: i32) -> (i32, i32) {
    %c0_i32 = arith.constant 0 : i32
    %c0_i32_0 = arith.constant 0 : i32
    return %arg0, %c0_i32 : i32, i32
  }
  func.func @transform_1(%arg0: i32) -> (i32, i32) {
    %c0_i32 = arith.constant 0 : i32
    %c0_i32_0 = arith.constant 0 : i32
    return %arg0, %c0_i32 : i32, i32
  }
  func.func @transform_2(%arg0: i32) -> (i32, i32, i32) {
    %c0_i32 = arith.constant 0 : i32
    %c0_i32_0 = arith.constant 0 : i32
    %c0_i32_1 = arith.constant 0 : i32
    %c0_i32_2 = arith.constant 0 : i32
    return %c0_i32, %c0_i32_0, %c0_i32_1 : i32, i32, i32
  }
  func.func @transform_3(%arg0: i32) -> (i32, i32) {
    %c0_i32 = arith.constant 0 : i32
    %c0_i32_0 = arith.constant 0 : i32
    %c0_i32_1 = arith.constant 0 : i32
    return %c0_i32, %c0_i32_0 : i32, i32
  }
  func.func @transform_4(%arg0: i32) -> (i32, i32) {
    %c0_i32 = arith.constant 0 : i32
    %c0_i32_0 = arith.constant 0 : i32
    return %arg0, %c0_i32 : i32, i32
  }
}

</mosaic_0001>

<bundles_post_ra>
// kernel: vae_forward.1
= control target key start
LH: loop header
LB: loop body
LE: loop exit
PB: predicated region body
PF: predicated region fallthrough
CT: control target
= control target key end

     0   :  { %9 = vsyncpa [#allocation4], 0  ;;  %s1517_s0 = inlined_call_operand.hbm [shape: f32[8,32], index: 0, kind: input, shape index: {}]   ;;  %s1518_s1 = inlined_call_operand.hbm [shape: f32[8,16], index: 1, kind: input, shape index: {}]   ;;  %s1519_s2 = inlined_call_operand.hbm [shape: f32[6,128,128], index: 2, kind: input, shape index: {}]   ;;  %s1520_s3 = inlined_call_operand.hbm [shape: f32[16,128], index: 3, kind: input, shape index: {}]   ;;  %s1521_s4 = inlined_call_operand.vmem [shape: f32[8,128], index: 4, kind: output, shape index: {}]  }
   0x1   :  { %10 = vsyncpa [#allocation6], 0 }
   0x2   :  { %11 = vsyncpa [#allocation9], 0  ;;  %s1365_s15 = smov [#allocation5]   ;;  %s1366_s17 = smov [#allocation3]  }
   0x3   :  { %s28_s16 = sshll.u32 %s1365_s15, 4  ;;  %s18_s18 = sshll.u32 %s1366_s17, 4  ;;  %s29_s16 = int_to_ptr.vmem [resolvable:$true] %s28_s16  ;;  %s19_s18 = int_to_ptr.vmem [resolvable:$true] %s18_s18 }
   0x4   :  { %s1271_s21 = scalar_lea.hbm %s1518_s1, 128 }
   0x5   :  { %p1272_p0 = scmp.ne.s32.totalorder %s1518_s1, %s1271_s21  ;;  %p1275_p1 = scmp.lt.u32.totalorder %s1271_s21, %s1518_s1 }
   0x7   :  { %p1277_p2 = pnand %p1275_p1, %p1272_p0 }
   0x9   :  { %1280 = shalt.err (!%p1277_p2)
}
   0xa   :  { %s1281_s26 = scalar_lea.vmem %s29_s16, 128  ;;  %p1286_p4 = scmp.lt.s32.totalorder %s29_s16, %s29_s16 }
   0xb   :  { %p1282_p3 = scmp.ne.s32.totalorder %s29_s16, %s1281_s26  ;;  %p1287_p5 = scmp.lt.s32.totalorder %s1281_s26, %s1281_s26 }
   0xd   :  { %p1288_p6 = por %p1287_p5, %p1286_p4 }
   0xf   :  { %p1289_p7 = pnand %p1288_p6, %p1282_p3 }
  0x11   :  { %1292 = shalt.err (!%p1289_p7)
}
  0x12   :  { %31 = dma.hbm_to_vmem [thread:$0]  %s1518_s1, 128, %s29_s16, [#allocation6]  }
  0x13   :  { %s1293_s5 = scalar_lea.hbm %s1517_s0, 128 }
  0x14   :  { %p1294_p8 = scmp.ne.s32.totalorder %s1517_s0, %s1293_s5  ;;  %p1297_p9 = scmp.lt.u32.totalorder %s1293_s5, %s1517_s0 }
  0x16   :  { %p1299_p10 = pnand %p1297_p9, %p1294_p8 }
  0x18   :  { %1302 = shalt.err (!%p1299_p10)
}
  0x19   :  { %s1303_s10 = scalar_lea.vmem %s19_s18, 128  ;;  %p1308_p12 = scmp.lt.s32.totalorder %s19_s18, %s19_s18 }
  0x1a   :  { %p1304_p11 = scmp.ne.s32.totalorder %s19_s18, %s1303_s10  ;;  %p1309_p13 = scmp.lt.s32.totalorder %s1303_s10, %s1303_s10 }
  0x1c   :  { %p1310_p0 = por %p1309_p13, %p1308_p12 }
  0x1e   :  { %p1311_p1 = pnand %p1310_p0, %p1304_p11 }
  0x20   :  { %1314 = shalt.err (!%p1311_p1)
}
  0x21   :  { %21 = dma.hbm_to_vmem [thread:$0]  %s1517_s0, 128, %s19_s18, [#allocation4]  }
  0x22   :  { %s1367_s12 = smov [#allocation7]   ;;  %s1315_s16 = scalar_lea.hbm %s1519_s2, 12288 }
  0x23   :  { %s37_s13 = sshll.u32 %s1367_s12, 4  ;;  %p1316_p2 = scmp.ne.s32.totalorder %s1519_s2, %s1315_s16  ;;  %s38_s13 = int_to_ptr.vmem [resolvable:$true] %s37_s13 }
  0x24   :  { %p1319_p3 = scmp.lt.u32.totalorder %s1315_s16, %s1519_s2 }
  0x26   :  { %p1321_p4 = pnand %p1319_p3, %p1316_p2 }
  0x28   :  { %1324 = shalt.err (!%p1321_p4)
}
  0x29   :  { %s1325_s22 = scalar_lea.vmem %s38_s13, 12288  ;;  %p1330_p6 = scmp.lt.s32.totalorder %s38_s13, %s38_s13 }
  0x2a   :  { %p1326_p5 = scmp.ne.s32.totalorder %s38_s13, %s1325_s22  ;;  %p1331_p7 = scmp.lt.s32.totalorder %s1325_s22, %s1325_s22 }
  0x2c   :  { %p1332_p8 = por %p1331_p7, %p1330_p6 }
  0x2e   :  { %p1333_p9 = pnand %p1332_p8, %p1326_p5 }
  0x30   :  { %1336 = shalt.err (!%p1333_p9)
}
  0x31   :  { %s1368_s0 = smov 128   ;;  %s1369_s18 = smov 8  }
  0x32   :  { %43 = dma.hbm_to_vmem [thread:$0]  %s1519_s2, 12288, %s38_s13, [#allocation6], %s1368_s0, %s1368_s0, %s1369_s18  }
  0x33   :  { %s1370_s25 = smov [#allocation8]   ;;  %s1337_s29 = scalar_lea.hbm %s1520_s3, 256 }
  0x34   :  { %s49_s26 = sshll.u32 %s1370_s25, 4  ;;  %p1338_p10 = scmp.ne.s32.totalorder %s1520_s3, %s1337_s29  ;;  %s50_s26 = int_to_ptr.vmem [resolvable:$true] %s49_s26 }
  0x35   :  { %p1341_p11 = scmp.lt.u32.totalorder %s1337_s29, %s1520_s3 }
  0x37   :  { %p1343_p12 = pnand %p1341_p11, %p1338_p10 }
  0x39   :  { %1346 = shalt.err (!%p1343_p12)
}
  0x3a   :  { %s1347_s8 = scalar_lea.vmem %s50_s26, 256  ;;  %p1352_p0 = scmp.lt.s32.totalorder %s50_s26, %s50_s26 }
  0x3b   :  { %p1348_p13 = scmp.ne.s32.totalorder %s50_s26, %s1347_s8  ;;  %p1353_p1 = scmp.lt.s32.totalorder %s1347_s8, %s1347_s8 }
  0x3d   :  { %p1354_p2 = por %p1353_p1, %p1352_p0 }
  0x3f   :  { %p1355_p3 = pnand %p1354_p2, %p1348_p13 }
  0x41   :  { %1358 = shalt.err (!%p1355_p3)
}
  0x42   :  { %55 = dma.hbm_to_vmem [thread:$0]  %s1520_s3, 256, %s50_s26, [#allocation9], %s1368_s0, %s1368_s0, %s1369_s18  }
  0x43   :  { %1359 = dma.done.wait [#allocation4], 128  }
  0x44   :  { %1360 = vsyncadd [#allocation4], 4294967168 }
  0x45   :  { %1361 = dma.done.wait [#allocation6], 12416  }
  0x46   :  { %1362 = vsyncadd [#allocation6], 4294954880 }
  0x47   :  { %1363 = dma.done.wait [#allocation9], 256  }
  0x48   :  { %1364 = vsyncadd [#allocation9], 4294967040  ;;  %v1371_v0 = vmov 0.0|0.0   ;;  %vm1372_vm0 = vmmov 0   ;;  %v1373_v1 = vmov 0.0   ;;  %v73_v2 = vld [vmem:[#allocation7] sm:$0xff] }
  0x49   :  { %1102 = vmatprep.subr.bf16.mxu0 %v1371_v0  ;;  %924 = vmatprep.mubr.msk.f32.mxu0 %vm1372_vm0, %v1373_v1  ;;  %68 = vst [vmem:[#allocation2] sm:$0xff] %v1373_v1  ;;  %v74_v3 = vld [vmem:[#allocation7 + $0x8] sm:$0xff]  ;;  %v75_v4 = vld [vmem:[#allocation7 + $0x10] sm:$0xff]  ;;  %v76_v6 = vld [vmem:[#allocation7 + $0x18] sm:$0xff]  ;;  %vm70_vm1 = vcmask 261120   ;;  %vm406_vm2 = vcmask 130048  }
  0x4a   :  { %1126 = vmatprep.subr.bf16.mxu1 %v1371_v0  ;;  %959 = vmatprep.mubr.msk.f32.mxu1 %vm1372_vm0, %v1373_v1  ;;  %v1103_v5 = vpack.c.bf16 %v74_v3, %v73_v2  ;;  %v1106_v7 = vpack.c.bf16 %v76_v6, %v75_v4  ;;  %v77_v8 = vld [vmem:[#allocation7 + $0x20] sm:$0xff]  ;;  %v78_v9 = vld [vmem:[#allocation7 + $0x28] sm:$0xff]  ;;  %v69_v10 = vld [vmem:[#allocation3] sm:$0xff]  ;;  %s1374_s3 = smov 112   ;;  %s1375_s10 = smov 32  }
  0x4b   :  { %71 = vst.msk [vmem:[#allocation2] sm:$0xff] %vm70_vm1, %v69_v10  ;;  %v1109_v11 = vpack.c.bf16 %v78_v9, %v77_v8  ;;  %v79_v12 = vld [vmem:[#allocation7 + $0x30] sm:$0xff]  ;;  %v80_v13 = vld [vmem:[#allocation7 + $0x38] sm:$0xff]  ;;  %v81_v15 = vld [vmem:[#allocation7 + $0x40] sm:$0xff] }
  0x4c   :  { %1104 = vmatpush3.bf16.msra.mxu0 %v1103_v5  ;;  %v1112_v14 = vpack.c.bf16 %v80_v13, %v79_v12  ;;  %v82_v16 = vld [vmem:[#allocation7 + $0x48] sm:$0xff]  ;;  %v405_v17 = vld [vmem:[#allocation5] sm:$0xff]  ;;  %v83_v20 = vld [vmem:[#allocation7 + $0x50] sm:$0xff] }
  0x4d   :  { %1105 = vmatprep.subr.bf16.mxu0 %v1371_v0  ;;  %v1115_v19 = vpack.c.bf16 %v82_v16, %v81_v15  ;;  %v84_v21 = vld [vmem:[#allocation7 + $0x58] sm:$0xff]  ;;  %v85_v23 = vld [vmem:[#allocation7 + $0x60] sm:$0xff]  ;;  %v86_v24 = vld [vmem:[#allocation7 + $0x68] sm:$0xff] }
  0x4e   :  { %v1118_v22 = vpack.c.bf16 %v84_v21, %v83_v20  ;;  %v1121_v25 = vpack.c.bf16 %v86_v24, %v85_v23  ;;  %v87_v26 = vld [vmem:[#allocation7 + $0x70] sm:$0xff]  ;;  %v88_v27 = vld [vmem:[#allocation7 + $0x78] sm:$0xff]  ;;  %v776_v29 = vld [vmem:[#allocation8] ss:$0 sm:$0xff] }
  0x4f   :  { %v1124_v28 = vpack.c.bf16 %v88_v27, %v87_v26  ;;  %v193_v33 = vld [vmem:[#allocation7 + $0x80] sm:$0xff]  ;;  %v194_v34 = vld [vmem:[#allocation7 + $0x88] sm:$0xff]  ;;  %v195_v35 = vld [vmem:[#allocation7 + $0x90] sm:$0xff] }
  0x50   :  { %1107 = vmatpush3.bf16.msra.mxu0 %v1106_v7  ;;  %v1127_v36 = vpack.c.bf16 %v194_v34, %v193_v33  ;;  %v196_v37 = vld [vmem:[#allocation7 + $0x98] sm:$0xff]  ;;  %v197_v43 = vld [vmem:[#allocation7 + $0xa0] sm:$0xff]  ;;  %v198_v44 = vld [vmem:[#allocation7 + $0xa8] sm:$0xff] }
  0x51   :  { %1108 = vmatprep.subr.bf16.mxu0 %v1371_v0  ;;  %v1130_v38 = vpack.c.bf16 %v196_v37, %v195_v35  ;;  %v1133_v45 = vpack.c.bf16 %v198_v44, %v197_v43  ;;  %v199_v46 = vld [vmem:[#allocation7 + $0xb0] sm:$0xff]  ;;  %v200_v47 = vld [vmem:[#allocation7 + $0xb8] sm:$0xff]  ;;  %v201_v49 = vld [vmem:[#allocation7 + $0xc0] sm:$0xff] }
  0x52   :  { %v72_v18 = vld [vmem:[#allocation2] sm:$0xff]  ;;  %1128 = vmatpush3.bf16.msra.mxu1 %v1127_v36  ;;  %v1136_v48 = vpack.c.bf16 %v200_v47, %v199_v46  ;;  %v203_v52 = vld [vmem:[#allocation7 + $0xd0] sm:$0xff]  ;;  %v204_v53 = vld [vmem:[#allocation7 + $0xd8] sm:$0xff] }
  0x53   :  { %404 = vst [vmem:[#allocation2] sm:$0xff] %v1373_v1  ;;  %1129 = vmatprep.subr.bf16.mxu1 %v1371_v0  ;;  %v202_v50 = vld [vmem:[#allocation7 + $0xc8] sm:$0xff]  ;;  %v1142_v54 = vpack.c.bf16 %v204_v53, %v203_v52  ;;  %v205_v55 = vld [vmem:[#allocation7 + $0xe0] sm:$0xff]  ;;  %v207_v58 = vld [vmem:[#allocation7 + $0xf0] sm:$0xff] }
  0x54   :  { %1110 = vmatpush3.bf16.msra.mxu0 %v1109_v11  ;;  %407 = vst.msk [vmem:[#allocation2] sm:$0xff] %vm406_vm2, %v405_v17  ;;  %v1139_v51 = vpack.c.bf16 %v202_v50, %v201_v49  ;;  %v206_v56 = vld [vmem:[#allocation7 + $0xe8] sm:$0xff]  ;;  %v208_v59 = vld [vmem:[#allocation7 + $0xf8] sm:$0xff]  ;;  %v777_v6 = vld [vmem:[#allocation8 + $0x1] ss:$0 sm:$0xff] }
  0x55   :  { %1111 = vmatprep.subr.bf16.mxu0 %v1371_v0  ;;  %v1145_v57 = vpack.c.bf16 %v206_v56, %v205_v55  ;;  %v1148_v60 = vpack.c.bf16 %v208_v59, %v207_v58  ;;  %v778_v8 = vld [vmem:[#allocation8 + $0x2] ss:$0 sm:$0xff]  ;;  %v779_v12 = vld [vmem:[#allocation8 + $0x3] ss:$0 sm:$0xff]  ;;  %v314_v17 = vld [vmem:[#allocation7 + $0x108] sm:$0xff] }
  0x56   :  { %1131 = vmatpush3.bf16.msra.mxu1 %v1130_v38  ;;  %v313_v16 = vld [vmem:[#allocation7 + $0x100] sm:$0xff]  ;;  %v316_v20 = vld [vmem:[#allocation7 + $0x118] sm:$0xff]  ;;  %v318_v27 = vld [vmem:[#allocation7 + $0x128] sm:$0xff] }
  0x57   :  { %1132 = vmatprep.subr.bf16.mxu1 %v1371_v0  ;;  %v317_v26 = vld [vmem:[#allocation7 + $0x120] sm:$0xff]  ;;  %v322_v33 = vld [vmem:[#allocation7 + $0x148] sm:$0xff]  ;;  %v323_v35 = vld [vmem:[#allocation7 + $0x150] sm:$0xff] }
  0x58   :  { %1113 = vmatpush3.bf16.msra.mxu0 %v1112_v14  ;;  %v324_v36 = vld [vmem:[#allocation7 + $0x158] sm:$0xff]  ;;  %v325_v38 = vld [vmem:[#allocation7 + $0x160] sm:$0xff]  ;;  %v418_v58 = vld [vmem:[#allocation7 + $0x188] sm:$0xff] }
  0x59   :  { %1114 = vmatprep.subr.bf16.mxu0 %v1371_v0  ;;  %v1166_v37 = vpack.c.bf16 %v324_v36, %v323_v35  ;;  %v781_v53 = vld [vmem:[#allocation8 + $0x5] ss:$0 sm:$0xff]  ;;  %v419_v59 = vld [vmem:[#allocation7 + $0x190] sm:$0xff]  ;;  %v537_v35 = vld [vmem:[#allocation7 + $0x208] sm:$0xff] }
  0x5a   :  { %1134 = vmatpush3.bf16.msra.mxu1 %v1133_v45  ;;  %v538_v36 = vld [vmem:[#allocation7 + $0x210] sm:$0xff] }
  0x5b   :  { %1135 = vmatprep.subr.bf16.mxu1 %v1371_v0 }
  0x5c   :  { %1116 = vmatpush3.bf16.msra.mxu0 %v1115_v19  ;;  %v1151_v19 = vpack.c.bf16 %v314_v17, %v313_v16  ;;  %v431_v17 = vld [vmem:[#allocation7 + $0x1f0] sm:$0xff] }
  0x5d   :  { %1117 = vmatprep.subr.bf16.mxu0 %v1371_v0 }
  0x5e   :  { %1137 = vmatpush3.bf16.msra.mxu1 %v1136_v48 }
  0x5f   :  { %1138 = vmatprep.subr.bf16.mxu1 %v1371_v0 }
  0x60   :  { %1119 = vmatpush3.bf16.msra.mxu0 %v1118_v22 }
  0x61   :  { %1120 = vmatprep.subr.bf16.mxu0 %v1371_v0 }
  0x62   :  { %1140 = vmatpush3.bf16.msra.mxu1 %v1139_v51  ;;  %v780_v51 = vld [vmem:[#allocation8 + $0x4] ss:$0 sm:$0xff] }
  0x63   :  { %1141 = vmatprep.subr.bf16.mxu1 %v1371_v0 }
  0x64   :  { %1122 = vmatpush3.bf16.msra.mxu0 %v1121_v25 }
  0x65   :  { %1123 = vmatprep.subr.bf16.mxu0 %v1371_v0 }
  0x66   :  { %1143 = vmatpush3.bf16.msra.mxu1 %v1142_v54 }
  0x67   :  { %1144 = vmatprep.subr.bf16.mxu1 %v1371_v0 }
  0x68   :  { %1125 = vmatpush3.bf16.msra.mxu0 %v1124_v28  ;;  %v1157_v28 = vpack.c.bf16 %v318_v27, %v317_v26  ;;  %v408_v26 = vld [vmem:[#allocation2] sm:$0xff] }
  0x69   :  { %1150 = vmatprep.subr.bf16.mxu0 %v1371_v0 }
  0x6a   :  { %1146 = vmatpush3.bf16.msra.mxu1 %v1145_v57  ;;  %v417_v57 = vld [vmem:[#allocation7 + $0x180] sm:$0xff] }
  0x6b   :  { %925 = vmatmul.mubr.f32.vlgmr.msra.gmra.mrb[0].mxu0 %v72_v18  ;;  %1147 = vmatprep.subr.bf16.mxu1 %v1371_v0  ;;  %v315_v18 = vld [vmem:[#allocation7 + $0x110] sm:$0xff] }
  0x6c   :  { %994 = vmatprep.mubr.msk.f32.mxu0 %vm1372_vm0, %v1373_v1  ;;  %1152 = vmatpush3.bf16.msra.mxu0 %v1151_v19  ;;  %v1154_v21 = vpack.c.bf16 %v316_v20, %v315_v18  ;;  %v432_v18 = vld [vmem:[#allocation7 + $0x1f8] sm:$0xff] }
  0x6d   :  { %1153 = vmatprep.subr.bf16.mxu0 %v1371_v0 }
  0x6e   :  { %1149 = vmatpush3.bf16.msra.mxu1 %v1148_v60  ;;  %v1175_v60 = vpack.c.bf16 %v418_v58, %v417_v57  ;;  %v550_v58 = vld [vmem:[#allocation7 + $0x270] sm:$0xff] }
  0x6f   :  { %1174 = vmatprep.subr.bf16.mxu1 %v1371_v0 }
  0x70   :  { %1155 = vmatpush3.bf16.msra.mxu0 %v1154_v21 }
  0x71   :  { %1156 = vmatprep.subr.bf16.mxu0 %v1371_v0 }
  0x74   :  { %1158 = vmatpush3.bf16.msra.mxu0 %v1157_v28 }
  0x75   :  { %1159 = vmatprep.subr.bf16.mxu0 %v1371_v0 }
 0x13e   :  { %v160_v30 = vpop.f32.mrb[0].mxu0 }
 0x13f   :  { %v161_v31 = vadd.f32 %v776_v29, %v160_v30  ;;  %v926_v32 = vpop.f32.mrb[1].mxu0  ;;  %v319_v29 = vld [vmem:[#allocation7 + $0x130] sm:$0xff]  ;;  %v320_v30 = vld [vmem:[#allocation7 + $0x138] sm:$0xff] }
 0x140   :  { %v321_v32 = vld [vmem:[#allocation7 + $0x140] sm:$0xff] }
 0x141   :  { %164 = vadd.xlane.f32.xlu0 %v161_v31  ;;  %v1163_v34 = vpack.c.bf16 %v322_v33, %v321_v32 }
 0x1ce   :  { %v165_v39 = vpop.xlane.xlu0 %164 }
 0x1cf   :  { %v167_v40 = vmul.f32 0.011111111, %v165_v39  ;;  %v326_v39 = vld [vmem:[#allocation7 + $0x168] sm:$0xff] }
 0x1d1   :  { %v168_v41 = vsub.f32 %v161_v31, %v167_v40  ;;  %v172_v61 = vmul.f32 38.0, %v167_v40  ;;  %v1160_v31 = vpack.c.bf16 %v320_v30, %v319_v29  ;;  %v783_v30 = vld [vmem:[#allocation8 + $0x7] ss:$0 sm:$0xff] }
 0x1d3   :  { %v169_v42 = vmul.f32 %v168_v41, %v168_v41  ;;  %v173_v62 = vmul.f32 %v172_v61, %v167_v40  ;;  %1161 = vmatpush3.bf16.msra.mxu0 %v1160_v31  ;;  %v1169_v40 = vpack.c.bf16 %v326_v39, %v325_v38  ;;  %v420_v61 = vld [vmem:[#allocation7 + $0x198] sm:$0xff] }
 0x1d4   :  { %1162 = vmatprep.subr.bf16.mxu0 %v1371_v0  ;;  %v539_v38 = vld [vmem:[#allocation7 + $0x218] sm:$0xff] }
 0x1d5   :  { %170 = vadd.xlane.f32.xlu0 %v169_v42  ;;  %v328_v42 = vld [vmem:[#allocation7 + $0x178] sm:$0xff]  ;;  %v1202_v39 = vpack.c.bf16 %v539_v38, %v538_v36  ;;  %v667_v38 = vld [vmem:[#allocation7 + $0x2e0] sm:$0xff] }
 0x1d6   :  { %v666_v36 = vld [vmem:[#allocation7 + $0x2d8] sm:$0xff] }
 0x1d7   :  { %1164 = vmatpush3.bf16.msra.mxu0 %v1163_v34  ;;  %v536_v34 = vld [vmem:[#allocation7 + $0x200] sm:$0xff] }
 0x1d8   :  { %1165 = vmatprep.subr.bf16.mxu0 %v1371_v0 }
 0x1db   :  { %1167 = vmatpush3.bf16.msra.mxu0 %v1166_v37  ;;  %v1199_v37 = vpack.c.bf16 %v537_v35, %v536_v34  ;;  %v665_v35 = vld [vmem:[#allocation7 + $0x2d0] sm:$0xff] }
 0x1dc   :  { %1168 = vmatprep.subr.bf16.mxu0 %v1371_v0 }
 0x1df   :  { %1170 = vmatpush3.bf16.msra.mxu0 %v1169_v40 }
 0x1e0   :  { %1171 = vmatprep.subr.bf16.mxu0 %v1371_v0 }
 0x262   :  { %v171_v63 = vpop.xlane.xlu0 %170 }
 0x263   :  { %v174_v2 = vsub.f32 %v171_v63, %v173_v62  ;;  %v1178_v62 = vpack.c.bf16 %v420_v61, %v419_v59  ;;  %v421_v63 = vld [vmem:[#allocation7 + $0x1a0] sm:$0xff]  ;;  %v551_v59 = vld [vmem:[#allocation7 + $0x278] sm:$0xff] }
 0x265   :  { %v175_v3 = vmul.f32 0.011111111, %v174_v2  ;;  %v422_v2 = vld [vmem:[#allocation7 + $0x1a8] sm:$0xff] }
 0x267   :  { %v176_v4 = vadd.f32 1e-05, %v175_v3  ;;  %v1181_v3 = vpack.c.bf16 %v422_v2, %v421_v63 }
 0x269   :  { %1257 = vrsqrt.f32 %v176_v4  ;;  %v423_v4 = vld [vmem:[#allocation7 + $0x1b0] sm:$0xff] }
 0x273   :  { %v1258_v5 = vpop.eup %1257 }
 0x274   :  { %v178_v7 = vmul.f32 %v1258_v5, %v168_v41  ;;  %v327_v41 = vld [vmem:[#allocation7 + $0x170] sm:$0xff]  ;;  %v424_v5 = vld [vmem:[#allocation7 + $0x1b8] sm:$0xff] }
 0x275   :  { %v1172_v43 = vpack.c.bf16 %v328_v42, %v327_v41 }
 0x276   :  { %v184_v9 = vmul.f32 %v777_v6, %v178_v7  ;;  %v1184_v6 = vpack.c.bf16 %v424_v5, %v423_v4  ;;  %v425_v7 = vld [vmem:[#allocation7 + $0x1c0] sm:$0xff] }
 0x277   :  { %1173 = vmatpush3.bf16.msra.mxu0 %v1172_v43  ;;  %v540_v43 = vld [vmem:[#allocation7 + $0x220] sm:$0xff] }
 0x278   :  { %v190_v10 = vadd.f32 %v778_v8, %v184_v9  ;;  %1198 = vmatprep.subr.bf16.mxu0 %v1371_v0  ;;  %v426_v8 = vld [vmem:[#allocation7 + $0x1c8] sm:$0xff] }
 0x279   :  { %v1187_v9 = vpack.c.bf16 %v426_v8, %v425_v7  ;;  %v785_v8 = vld [vmem:[#allocation8 + $0x9] ss:$0 sm:$0xff] }
 0x27a   :  { %v191_v11 = vmax.f32 %v190_v10, 0.0  ;;  %v427_v10 = vld [vmem:[#allocation7 + $0x1d0] sm:$0xff] }
 0x27c   :  { %960 = vmatmul.mubr.f32.vlgmr.msra.gmra.mrb[0].mxu1 %v191_v11  ;;  %v428_v11 = vld [vmem:[#allocation7 + $0x1d8] sm:$0xff] }
 0x27d   :  { %1029 = vmatprep.mubr.msk.f32.mxu1 %vm1372_vm0, %v1373_v1  ;;  %1176 = vmatpush3.bf16.msra.mxu1 %v1175_v60  ;;  %v1220_v60 = vpack.c.bf16 %v551_v59, %v550_v58  ;;  %v789_v58 = vld [vmem:[#allocation8 + $0xd] ss:$0 sm:$0xff] }
 0x27e   :  { %1177 = vmatprep.subr.bf16.mxu1 %v1371_v0 }
 0x281   :  { %1179 = vmatpush3.bf16.msra.mxu1 %v1178_v62 }
 0x282   :  { %1180 = vmatprep.subr.bf16.mxu1 %v1371_v0 }
 0x285   :  { %1182 = vmatpush3.bf16.msra.mxu1 %v1181_v3 }
 0x286   :  { %1183 = vmatprep.subr.bf16.mxu1 %v1371_v0 }
 0x289   :  { %1185 = vmatpush3.bf16.msra.mxu1 %v1184_v6  ;;  %v784_v6 = vld [vmem:[#allocation8 + $0x8] ss:$0 sm:$0xff] }
 0x28a   :  { %1186 = vmatprep.subr.bf16.mxu1 %v1371_v0 }
 0x28d   :  { %1188 = vmatpush3.bf16.msra.mxu1 %v1187_v9 }
 0x28e   :  { %1189 = vmatprep.subr.bf16.mxu1 %v1371_v0 }
 0x34f   :  { %v280_v13 = vpop.f32.mrb[0].mxu1 }
 0x350   :  { %v281_v14 = vadd.f32 %v779_v12, %v280_v13  ;;  %v961_v15 = vpop.f32.mrb[1].mxu1  ;;  %v1190_v12 = vpack.c.bf16 %v428_v11, %v427_v10  ;;  %v429_v13 = vld [vmem:[#allocation7 + $0x1e0] sm:$0xff] }
 0x351   :  { %v782_v15 = vld [vmem:[#allocation8 + $0x6] ss:$0 sm:$0xff] }
 0x352   :  { %284 = vadd.xlane.f32.xlu1 %v281_v14  ;;  %1191 = vmatpush3.bf16.msra.mxu1 %v1190_v12  ;;  %v786_v12 = vld [vmem:[#allocation8 + $0xa] ss:$0 sm:$0xff] }
 0x353   :  { %1192 = vmatprep.subr.bf16.mxu1 %v1371_v0 }
 0x3df   :  { %v285_v22 = vpop.xlane.xlu1 %284 }
 0x3e0   :  { %v287_v23 = vmul.f32 0.020833334, %v285_v22  ;;  %v1196_v22 = vpack.c.bf16 %v432_v18, %v431_v17  ;;  %v656_v17 = vld [vmem:[#allocation7 + $0x288] sm:$0xff]  ;;  %v657_v18 = vld [vmem:[#allocation7 + $0x290] sm:$0xff] }
 0x3e2   :  { %v288_v24 = vsub.f32 %v281_v14, %v287_v23  ;;  %v292_v44 = vmul.f32 80.0, %v287_v23  ;;  %v430_v14 = vld [vmem:[#allocation7 + $0x1e8] sm:$0xff] }
 0x3e3   :  { %v1193_v16 = vpack.c.bf16 %v430_v14, %v429_v13 }
 0x3e4   :  { %v289_v25 = vmul.f32 %v288_v24, %v288_v24  ;;  %v293_v45 = vmul.f32 %v292_v44, %v287_v23  ;;  %v541_v44 = vld [vmem:[#allocation7 + $0x228] sm:$0xff] }
 0x3e5   :  { %1194 = vmatpush3.bf16.msra.mxu1 %v1193_v16  ;;  %v655_v16 = vld [vmem:[#allocation7 + $0x280] sm:$0xff] }
 0x3e6   :  { %290 = vadd.xlane.f32.xlu1 %v289_v25  ;;  %1195 = vmatprep.subr.bf16.mxu1 %v1371_v0 }
 0x3e9   :  { %1197 = vmatpush3.bf16.msra.mxu1 %v1196_v22 }
 0x3ea   :  { %1222 = vmatprep.subr.bf16.mxu1 %v1371_v0 }
 0x473   :  { %v291_v46 = vpop.xlane.xlu1 %290 }
 0x474   :  { %v294_v47 = vsub.f32 %v291_v46, %v293_v45  ;;  %v1205_v45 = vpack.c.bf16 %v541_v44, %v540_v43  ;;  %v542_v46 = vld [vmem:[#allocation7 + $0x230] sm:$0xff] }
 0x476   :  { %v295_v48 = vmul.f32 0.020833334, %v294_v47  ;;  %v543_v47 = vld [vmem:[#allocation7 + $0x238] sm:$0xff] }
 0x478   :  { %v296_v49 = vadd.f32 1e-05, %v295_v48  ;;  %v1208_v48 = vpack.c.bf16 %v543_v47, %v542_v46 }
 0x47a   :  { %1259 = vrsqrt.f32 %v296_v49  ;;  %v544_v49 = vld [vmem:[#allocation7 + $0x240] sm:$0xff] }
 0x484   :  { %v1260_v50 = vpop.eup %1259 }
 0x485   :  { %v298_v52 = vmul.f32 %v1260_v50, %v288_v24  ;;  %v545_v50 = vld [vmem:[#allocation7 + $0x248] sm:$0xff] }
 0x487   :  { %v304_v54 = vmul.f32 %v780_v51, %v298_v52  ;;  %v1211_v51 = vpack.c.bf16 %v545_v50, %v544_v49  ;;  %v546_v52 = vld [vmem:[#allocation7 + $0x250] sm:$0xff]  ;;  %v787_v50 = vld [vmem:[#allocation8 + $0xb] ss:$0 sm:$0xff] }
 0x489   :  { %v310_v55 = vadd.f32 %v781_v53, %v304_v54  ;;  %v547_v53 = vld [vmem:[#allocation7 + $0x258] sm:$0xff] }
 0x48a   :  { %v1214_v54 = vpack.c.bf16 %v547_v53, %v546_v52  ;;  %v788_v52 = vld [vmem:[#allocation8 + $0xc] ss:$0 sm:$0xff] }
 0x48b   :  { %v311_v56 = vmax.f32 %v310_v55, 0.0  ;;  %v548_v55 = vld [vmem:[#allocation7 + $0x260] sm:$0xff] }
 0x48d   :  { %995 = vmatmul.mubr.f32.vlgmr.msra.gmra.mrb[2].mxu0 %v311_v56  ;;  %v549_v56 = vld [vmem:[#allocation7 + $0x268] sm:$0xff] }
 0x48e   :  { %1064 = vmatprep.mubr.msk.f32.mxu0 %vm1372_vm0, %v1373_v1  ;;  %1200 = vmatpush3.bf16.msra.mxu0 %v1199_v37  ;;  %v1217_v57 = vpack.c.bf16 %v549_v56, %v548_v55  ;;  %v1238_v37 = vpack.c.bf16 %v666_v36, %v665_v35  ;;  %v746_v56 = vlaneseq }
 0x48f   :  { %1201 = vmatprep.subr.bf16.mxu0 %v1371_v0 }
 0x492   :  { %1203 = vmatpush3.bf16.msra.mxu0 %v1202_v39  ;;  %v668_v39 = vld [vmem:[#allocation7 + $0x2e8] sm:$0xff] }
 0x493   :  { %1204 = vmatprep.subr.bf16.mxu0 %v1371_v0 }
 0x496   :  { %1206 = vmatpush3.bf16.msra.mxu0 %v1205_v45 }
 0x497   :  { %1207 = vmatprep.subr.bf16.mxu0 %v1371_v0 }
 0x49a   :  { %1209 = vmatpush3.bf16.msra.mxu0 %v1208_v48 }
 0x49b   :  { %1210 = vmatprep.subr.bf16.mxu0 %v1371_v0 }
 0x49e   :  { %1212 = vmatpush3.bf16.msra.mxu0 %v1211_v51 }
 0x49f   :  { %1213 = vmatprep.subr.bf16.mxu0 %v1371_v0 }
 0x4a2   :  { %1215 = vmatpush3.bf16.msra.mxu0 %v1214_v54 }
 0x4a3   :  { %1216 = vmatprep.subr.bf16.mxu0 %v1371_v0 }
 0x4a6   :  { %1218 = vmatpush3.bf16.msra.mxu0 %v1217_v57  ;;  %v747_v57 = vand.u32 127, %v746_v56 }
 0x4a7   :  { %1219 = vmatprep.subr.bf16.mxu0 %v1371_v0 }
 0x4a8   :  { %vm748_vm3 = vcmp.lt.s32.totalorder %v747_v57, 32 }
 0x4aa   :  { %1221 = vmatpush3.bf16.msra.mxu0 %v1220_v60 }
 0x560   :  { %v400_v19 = vpop.f32.mrb[2].mxu0 }
 0x561   :  { %v401_v20 = vadd.f32 %v782_v15, %v400_v19  ;;  %v996_v21 = vpop.f32.mrb[3].mxu0  ;;  %v1223_v19 = vpack.c.bf16 %v656_v17, %v655_v16 }
 0x563   :  { %409 = vrot.lane.b32.xlu0 %v401_v20, %s1374_s3 }
 0x567   :  { %765 = vrot.lane.b32.xlu0 %v401_v20, %s1375_s10 }
 0x5d5   :  { %v410_v23 = vpop.permute.xlu0 %409 }
 0x5d6   :  { %v411_v24 = vmul.f32 0.5, %v410_v23 }
 0x5d8   :  { %v412_v25 = vmul.f32 1.442695, %v411_v24 }
 0x5da   :  { %1261 = vpow2.f32 %v412_v25 }
 0x5e4   :  { %v1262_v27 = vpop.eup %1261 }
 0x5e5   :  { %v414_v28 = vmul.f32 %v1262_v27, %v408_v26  ;;  %v659_v26 = vld [vmem:[#allocation7 + $0x2a0] sm:$0xff]  ;;  %v660_v27 = vld [vmem:[#allocation7 + $0x2a8] sm:$0xff] }
 0x5e7   :  { %v415_v29 = vadd.f32 %v414_v28, %v401_v20  ;;  %v658_v20 = vld [vmem:[#allocation7 + $0x298] sm:$0xff]  ;;  %v1229_v28 = vpack.c.bf16 %v660_v27, %v659_v26 }
 0x5e8   :  { %v1226_v21 = vpack.c.bf16 %v658_v20, %v657_v18 }
 0x5e9   :  { %1030 = vmatmul.mubr.f32.vlgmr.msra.gmra.mrb[2].mxu1 %v415_v29  ;;  %v661_v29 = vld [vmem:[#allocation7 + $0x2b0] sm:$0xff] }
 0x5ea   :  { %1099 = vmatprep.mubr.msk.f32.mxu1 %vm1372_vm0, %v1373_v1  ;;  %1224 = vmatpush3.bf16.msra.mxu1 %v1223_v19 }
 0x5eb   :  { %1225 = vmatprep.subr.bf16.mxu1 %v1371_v0 }
 0x5ee   :  { %1227 = vmatpush3.bf16.msra.mxu1 %v1226_v21 }
 0x5ef   :  { %1228 = vmatprep.subr.bf16.mxu1 %v1371_v0 }
 0x5f2   :  { %1230 = vmatpush3.bf16.msra.mxu1 %v1229_v28 }
 0x5f3   :  { %1231 = vmatprep.subr.bf16.mxu1 %v1371_v0 }
 0x6bc   :  { %v504_v31 = vpop.f32.mrb[2].mxu1 }
 0x6bd   :  { %v505_v32 = vadd.f32 %v783_v30, %v504_v31  ;;  %v1031_v33 = vpop.f32.mrb[3].mxu1  ;;  %v662_v30 = vld [vmem:[#allocation7 + $0x2b8] sm:$0xff] }
 0x6be   :  { %v1232_v31 = vpack.c.bf16 %v662_v30, %v661_v29  ;;  %v664_v33 = vld [vmem:[#allocation7 + $0x2c8] sm:$0xff] }
 0x6bf   :  { %508 = vadd.xlane.f32.xlu1 %v505_v32 }
 0x6c0   :  { %1233 = vmatpush3.bf16.msra.mxu1 %v1232_v31 }
 0x6c1   :  { %1234 = vmatprep.subr.bf16.mxu1 %v1371_v0 }
 0x74c   :  { %v509_v40 = vpop.xlane.xlu1 %508 }
 0x74d   :  { %v510_v41 = vmul.f32 0.020833334, %v509_v40  ;;  %v1241_v40 = vpack.c.bf16 %v668_v39, %v667_v38 }
 0x74f   :  { %v511_v1 = vsub.f32 %v505_v32, %v510_v41  ;;  %v515_v61 = vmul.f32 80.0, %v510_v41  ;;  %v663_v32 = vld [vmem:[#allocation7 + $0x2c0] sm:$0xff] }
 0x750   :  { %v1235_v34 = vpack.c.bf16 %v664_v33, %v663_v32 }
 0x751   :  { %v512_v42 = vmul.f32 %v511_v1, %v511_v1  ;;  %v516_v62 = vmul.f32 %v515_v61, %v510_v41  ;;  %v669_v41 = vld [vmem:[#allocation7 + $0x2f0] sm:$0xff] }
 0x752   :  { %1236 = vmatpush3.bf16.msra.mxu1 %v1235_v34 }
 0x753   :  { %513 = vadd.xlane.f32.xlu1 %v512_v42  ;;  %1237 = vmatprep.subr.bf16.mxu1 %v1371_v0 }
 0x756   :  { %1239 = vmatpush3.bf16.msra.mxu1 %v1238_v37 }
 0x757   :  { %1240 = vmatprep.subr.bf16.mxu1 %v1371_v0 }
 0x75a   :  { %1242 = vmatpush3.bf16.msra.mxu1 %v1241_v40 }
 0x75b   :  { %1243 = vmatprep.subr.bf16.mxu1 %v1371_v0 }
 0x7e0   :  { %v514_v63 = vpop.xlane.xlu1 %513 }
 0x7e1   :  { %v517_v2 = vsub.f32 %v514_v63, %v516_v62 }
 0x7e3   :  { %v518_v3 = vmul.f32 0.020833334, %v517_v2 }
 0x7e5   :  { %v519_v4 = vadd.f32 1e-05, %v518_v3 }
 0x7e7   :  { %1263 = vrsqrt.f32 %v519_v4 }
 0x7f1   :  { %v1264_v5 = vpop.eup %1263 }
 0x7f2   :  { %v521_v7 = vmul.f32 %v1264_v5, %v511_v1  ;;  %v670_v1 = vld [vmem:[#allocation7 + $0x2f8] sm:$0xff] }
 0x7f3   :  { %v1244_v42 = vpack.c.bf16 %v670_v1, %v669_v41 }
 0x7f4   :  { %v527_v9 = vmul.f32 %v784_v6, %v521_v7 }
 0x7f5   :  { %1245 = vmatpush3.bf16.msra.mxu1 %v1244_v42 }
 0x7f6   :  { %v533_v10 = vadd.f32 %v785_v8, %v527_v9 }
 0x7f8   :  { %v534_v11 = vmax.f32 %v533_v10, 0.0 }
 0x7fa   :  { %1065 = vmatmul.mubr.f32.vlgmr.msra.gmra.mrb[4].mxu0 %v534_v11  ;;  %v766_v11 = vpop.permute.xlu0 %765 }
 0x8cd   :  { %v623_v13 = vpop.f32.mrb[4].mxu0 }
 0x8ce   :  { %v624_v14 = vadd.f32 %v786_v12, %v623_v13  ;;  %v1066_v15 = vpop.f32.mrb[5].mxu0 }
 0x8d0   :  { %627 = vadd.xlane.f32.xlu1 %v624_v14 }
 0x95d   :  { %v628_v22 = vpop.xlane.xlu1 %627 }
 0x95e   :  { %v629_v23 = vmul.f32 0.011111111, %v628_v22 }
 0x960   :  { %v630_v24 = vsub.f32 %v624_v14, %v629_v23  ;;  %v634_v43 = vmul.f32 38.0, %v629_v23 }
 0x962   :  { %v631_v25 = vmul.f32 %v630_v24, %v630_v24  ;;  %v635_v44 = vmul.f32 %v634_v43, %v629_v23 }
 0x964   :  { %632 = vadd.xlane.f32.xlu1 %v631_v25 }
 0x9f1   :  { %v633_v45 = vpop.xlane.xlu1 %632 }
 0x9f2   :  { %v636_v46 = vsub.f32 %v633_v45, %v635_v44 }
 0x9f4   :  { %v637_v47 = vmul.f32 0.011111111, %v636_v46 }
 0x9f6   :  { %v638_v48 = vadd.f32 1e-05, %v637_v47 }
 0x9f8   :  { %1265 = vrsqrt.f32 %v638_v48 }
 0xa02   :  { %v1266_v49 = vpop.eup %1265 }
 0xa03   :  { %v640_v51 = vmul.f32 %v1266_v49, %v630_v24 }
 0xa05   :  { %v646_v53 = vmul.f32 %v787_v50, %v640_v51 }
 0xa07   :  { %v652_v54 = vadd.f32 %v788_v52, %v646_v53 }
 0xa09   :  { %v653_v55 = vmax.f32 %v652_v54, 0.0 }
 0xa0b   :  { %1100 = vmatmul.mubr.f32.vlgmr.msra.gmra.mrb[4].mxu1 %v653_v55 }
 0xade   :  { %v742_v0 = vpop.f32.mrb[4].mxu1 }
 0xadf   :  { %v743_v59 = vadd.f32 %v789_v58, %v742_v0  ;;  %v1101_v60 = vpop.f32.mrb[5].mxu1 }
 0xae1   :  { %v751_v61 = vsel %vm748_vm3, %v743_v59, -inf }
 0xae2   :  { %752 = vmax.xlane.f32.xlu1 %v751_v61 }
 0xb6f   :  { %v753_v62 = vpop.xlane.xlu1 %752 }
 0xb70   :  { %v754_v63 = vsub.f32 %v743_v59, %v753_v62 }
 0xb72   :  { %v755_v2 = vmul.f32 1.442695, %v754_v63 }
 0xb74   :  { %1267 = vpow2.f32 %v755_v2 }
 0xb7e   :  { %v1268_v3 = vpop.eup %1267 }
 0xb7f   :  { %v757_v4 = vsel %vm748_vm3, %v1268_v3, 0.0 }
 0xb80   :  { %758 = vadd.xlane.f32.xlu1 %v757_v4 }
 0xc0d   :  { %v759_v5 = vpop.xlane.xlu1 %758 }
 0xc0e   :  { %1269 = vrcp.f32 %v759_v5 }
 0xc18   :  { %v1270_v6 = vpop.eup %1269 }
 0xc19   :  { %v761_v7 = vmul.f32 %v1270_v6, %v759_v5 }
 0xc1b   :  { %v762_v8 = vsub.f32 2.0, %v761_v7 }
 0xc1d   :  { %v763_v9 = vmul.f32 %v1270_v6, %v762_v8 }
 0xc1f   :  { %v764_v10 = vmul.f32 %v763_v9, %v757_v4 }
 0xc21   :  { %v767_v12 = vsel %vm748_vm3, %v764_v10, %v766_v11 }
 0xc22   :  { %768 = vst [vmem:[%s1521_s4] sm:$0xff] %v767_v12 }
 0xc23   :  { %773 = vsyncpa [#allocation4], 1 }
 0xc24   :  { %774 = vsyncpa [#allocation6], 1 }
 0xc25   :  { %775 = vsyncpa [#allocation9], 1 }

</bundles_post_ra>
